<compile_context>
chip_gen: v5e
topology: v5e:2x2
jax: 0.10.0
libtpu: 0.0.40
codegen_flags: <defaults>
</compile_context>

<pallas_src>
import functools

import jax
import jax.numpy as jnp
from jax import lax
from jax.experimental import pallas as pl
from jax.experimental.pallas import tpu as pltpu


# ----------------------------------------------------------------------------
# Kernels
# ----------------------------------------------------------------------------
def _not_self_mask(ta, cc, block_rows):
    """bool [TA, C]: True where global anchor row != contrast column."""
    row_ids = (pl.program_id(0) * block_rows
               + lax.broadcasted_iota(jnp.int32, (ta, 1), 0))   # [TA, 1]
    col_ids = lax.broadcasted_iota(jnp.int32, (1, cc), 1)       # [1,  C]
    return row_ids != col_ids                                   # broadcast


def _supcon_epilogue(adc, pos, not_self, loss_ref, temperature,
                     base_temperature):
    """Shared epilogue: spec-style normalization, masked log-softmax, loss.

    adc:      [TA, C] f32 anchor . contrast / temperature
    pos:      [TA, C] bool positives (self-contrast already excluded)
    not_self: [TA, C] bool
    """
    # logits = (x - row_max) / (row_min - row_max)  (exactly as in the spec).
    row_max = jnp.max(adc, axis=1, keepdims=True)
    row_min = jnp.min(adc, axis=1, keepdims=True)
    inv_span = pl.reciprocal(row_min - row_max, approx=True)    # [TA, 1], EUP
    logits = (adc - row_max) * inv_span

    # Softmax denominator over non-self contrasts (no f32 mask multiply).
    exp_logits = jnp.where(not_self, jnp.exp(logits), 0.0)
    log_denom = jnp.log(jnp.sum(exp_logits, axis=1, keepdims=True))
    log_prob = logits - log_denom

    # Mean log-prob over positives.  No eps guard: matches the reference,
    # which also produces NaN when an anchor has no positives.
    n_pos = jnp.sum(pos.astype(jnp.float32), axis=1, keepdims=True)
    sum_pos_lp = jnp.sum(jnp.where(pos, log_prob, 0.0), axis=1, keepdims=True)
    mean_log_prob_pos = sum_pos_lp * pl.reciprocal(n_pos, approx=True)

    loss_ref[...] = (-(temperature / base_temperature)
                     * mean_log_prob_pos).astype(loss_ref.dtype)


def _supcon_label_kernel(a_lab_ref, c_lab_ref, anchor_ref, contrast_t_ref,
                         loss_ref, *, temperature, base_temperature,
                         block_rows):
    """Label-driven positives (covers labels=... and labels=None/SimCLR).

    a_lab_ref:      [TA, 1] int32 anchor labels for this tile
    c_lab_ref:      [1,  C] int32 contrast labels (grid-invariant)
    anchor_ref:     [TA, D] bf16 anchor features
    contrast_t_ref: [D,  C] bf16 contrast features, pre-transposed
    loss_ref:       [TA, 1] f32 per-anchor loss
    """
    adc = lax.dot_general(
        anchor_ref[...], contrast_t_ref[...],
        (((1,), (0,)), ((), ())),
        preferred_element_type=jnp.float32) * (1.0 / temperature)
    ta, cc = adc.shape
    not_self = _not_self_mask(ta, cc, block_rows)
    pos = (a_lab_ref[...] == c_lab_ref[...]) & not_self
    _supcon_epilogue(adc, pos, not_self, loss_ref, temperature,
                     base_temperature)


def _supcon_mask_kernel(mask_ref, anchor_ref, contrast_t_ref, loss_ref, *,
                        temperature, base_temperature, block_rows):
    """Explicit (binary) mask path; mask streamed as int8 instead of f32."""
    adc = lax.dot_general(
        anchor_ref[...], contrast_t_ref[...],
        (((1,), (0,)), ((), ())),
        preferred_element_type=jnp.float32) * (1.0 / temperature)
    ta, cc = adc.shape
    not_self = _not_self_mask(ta, cc, block_rows)
    pos = (mask_ref[...] != 0) & not_self
    _supcon_epilogue(adc, pos, not_self, loss_ref, temperature,
                     base_temperature)


# ----------------------------------------------------------------------------
# Wrapper
# ----------------------------------------------------------------------------
def _choose_block_rows(A, C, D, requested):
    """Anchor-row tile: multiple of 8 dividing A, VMEM-bounded, >=2 grid steps."""
    if requested is not None:
        if A % requested == 0 and (requested % 8 == 0 or requested == A):
            return requested
        return A
    # Conservative VMEM budget: double-buffered bf16 [D, C] contrast is
    # resident; ~6 live f32 [block_rows, C] intermediates plus the
    # double-buffered bf16 anchor tile scale with block_rows.
    budget = 40 * 1024 * 1024
    resident = 4 * D * C
    avail = max(budget - resident, 2 * 1024 * 1024)
    cap = int(max(8, min(512, avail // (24 * C + 4 * D + 8))))
    # v7x has 2 TensorCores per chip: keep the parallel grid >= 2 steps.
    if A >= 16:
        cap = min(cap, A // 2)
    cap = max(8, (cap // 8) * 8)
    for cand in range(cap, 7, -8):
        if A % cand == 0:
            return cand
    # A not a multiple of 8: fall back to one full-height tile.
    # (Could pad A to a multiple of 8 with masked tail rows instead.)
    return A


def supcon_loss(features, labels=None, mask=None, *,
                temperature=0.07, contrast_mode="all", base_temperature=0.07,
                block_rows=None):
    """Pallas implementation of SupConLoss.forward. Returns a scalar loss."""
    if features.ndim < 3:
        raise ValueError("`features` needs to be [bsz, n_views, ...]")
    if features.ndim > 3:
        features = features.reshape(features.shape[0], features.shape[1], -1)
    features = features.astype(jnp.float32)
    bsz, n_views, dim = features.shape

    if labels is not None and mask is not None:
        raise ValueError("Cannot define both `labels` and `mask`")

    contrast_count = n_views
    # torch.cat(torch.unbind(features, dim=1), dim=0) == view-major stacking.
    contrast_feature = jnp.transpose(features, (1, 0, 2)).reshape(
        n_views * bsz, dim)

    if contrast_mode == "one":
        anchor_feature = features[:, 0]
        anchor_count = 1
    elif contrast_mode == "all":
        anchor_feature = contrast_feature
        anchor_count = contrast_count
    else:
        raise ValueError(f"Unknown mode: {contrast_mode}")

    A = anchor_count * bsz          # number of anchors (rows)
    C = contrast_count * bsz        # number of contrasts (cols)

    # bf16 into the MXU (f32 accumulation in-kernel); contrast pre-transposed
    # to [D, C] so the kernel contracts [TA, D] x [D, C] with no in-kernel
    # transpose of the big grid-invariant operand.
    anchor_bf16 = anchor_feature.astype(jnp.bfloat16)
    contrast_t_bf16 = jnp.transpose(contrast_feature.astype(jnp.bfloat16))

    block_rows = _choose_block_rows(A, C, dim, block_rows)
    grid = (A // block_rows,)

    cost = pl.CostEstimate(
        flops=2 * A * C * dim,
        transcendentals=A * C + 3 * A,
        bytes_accessed=A * dim * 2 + dim * C * 2 + (A + C) * 4 + A * 4)
    compiler_params = pltpu.CompilerParams(
        dimension_semantics=("parallel",),
        vmem_limit_bytes=48 * 1024 * 1024)

    common_specs = [
        pl.BlockSpec((block_rows, dim), lambda i: (i, 0)),   # anchor tile
        pl.BlockSpec((dim, C), lambda i: (0, 0)),            # contrast^T (invariant)
    ]
    out_spec = pl.BlockSpec((block_rows, 1), lambda i: (i, 0))
    out_shape = jax.ShapeDtypeStruct((A, 1), jnp.float32)

    if mask is None:
        # Label path (labels=None => sample index as label == eye mask).
        if labels is None:
            base_labels = jnp.arange(bsz, dtype=jnp.int32)
        else:
            base_labels = jnp.asarray(labels).reshape(-1).astype(jnp.int32)
            if base_labels.shape[0] != bsz:
                raise ValueError("Num of labels does not match num of features")
        contrast_labels = jnp.tile(base_labels, (contrast_count,))     # [C]
        anchor_labels = (base_labels if contrast_mode == "one"
                         else contrast_labels)                          # [A]
        kernel = functools.partial(
            _supcon_label_kernel,
            temperature=float(temperature),
            base_temperature=float(base_temperature),
            block_rows=block_rows)
        per_anchor = pl.pallas_call(
            kernel,
            out_shape=out_shape,
            grid=grid,
            in_specs=[
                pl.BlockSpec((block_rows, 1), lambda i: (i, 0)),  # anchor labels
                pl.BlockSpec((1, C), lambda i: (0, 0)),           # contrast labels
            ] + common_specs,
            out_specs=out_spec,
            compiler_params=compiler_params,
            cost_estimate=cost,
        )(anchor_labels.reshape(A, 1), contrast_labels.reshape(1, C),
          anchor_bf16, contrast_t_bf16)
    else:
        # Explicit-mask path.  Docstring defines the mask as binary, so it is
        # shipped int8 (4x less HBM/VMEM than f32).
        base_mask = (jnp.asarray(mask) != 0).astype(jnp.int8)
        if base_mask.shape != (bsz, bsz):
            raise ValueError("`mask` must be [bsz, bsz]")
        mask_full = jnp.tile(base_mask, (anchor_count, contrast_count))
        kernel = functools.partial(
            _supcon_mask_kernel,
            temperature=float(temperature),
            base_temperature=float(base_temperature),
            block_rows=block_rows)
        per_anchor = pl.pallas_call(
            kernel,
            out_shape=out_shape,
            grid=grid,
            in_specs=[
                pl.BlockSpec((block_rows, C), lambda i: (i, 0)),  # tiled i8 mask
            ] + common_specs,
            out_specs=out_spec,
            compiler_params=compiler_params,
            cost_estimate=cost,
        )(mask_full, anchor_bf16, contrast_t_bf16)

    # loss.view(anchor_count, batch_size).mean() == mean over all A anchors.
    return jnp.mean(per_anchor)


# ----------------------------------------------------------------------------
# Pure-JAX reference (line-by-line port of the PyTorch module) for validation
# ----------------------------------------------------------------------------
def supcon_loss_ref(features, labels=None, mask=None, *,
                    temperature=0.07, contrast_mode="all",
                    base_temperature=0.07):
    if features.ndim > 3:
        features = features.reshape(features.shape[0], features.shape[1], -1)
    features = features.astype(jnp.float32)
    bsz = features.shape[0]
    if labels is None and mask is None:
        mask = jnp.eye(bsz, dtype=jnp.float32)
    elif labels is not None:
        labels = labels.reshape(-1, 1)
        mask = (labels == labels.T).astype(jnp.float32)
    else:
        mask = mask.astype(jnp.float32)
    contrast_count = features.shape[1]
    contrast_feature = jnp.concatenate(
        [features[:, v] for v in range(contrast_count)], axis=0)
    if contrast_mode == "one":
        anchor_feature, anchor_count = features[:, 0], 1
    else:
        anchor_feature, anchor_count = contrast_feature, contrast_count
    adc = jnp.matmul(anchor_feature, contrast_feature.T,
                     precision=jax.lax.Precision.HIGHEST) / temperature
    logits_max = jnp.max(adc, axis=1, keepdims=True)
    logits_min = jnp.min(adc, axis=1, keepdims=True)
    logits = (adc - logits_max) / (logits_min - logits_max)
    mask = jnp.tile(mask, (anchor_count, contrast_count))
    n_anchor = bsz * anchor_count
    logits_mask = 1.0 - jnp.eye(n_anchor, adc.shape[1], dtype=jnp.float32)
    mask = mask * logits_mask
    exp_logits = jnp.exp(logits) * logits_mask
    log_prob = logits - jnp.log(jnp.sum(exp_logits, axis=1, keepdims=True))
    mean_log_prob_pos = jnp.sum(mask * log_prob, axis=1) / jnp.sum(mask, axis=1)
    loss = -(temperature / base_temperature) * mean_log_prob_pos
    return jnp.mean(loss.reshape(anchor_count, bsz))


if __name__ == "__main__":
    key = jax.random.PRNGKey(0)
    fkey, lkey = jax.random.split(key)

    bsz, n_views, dim = 32, 2, 128
    features = jax.random.normal(fkey, (bsz, n_views, dim), jnp.float32)
    features = features / jnp.linalg.norm(features, axis=-1, keepdims=True)
    labels = jax.random.randint(lkey, (bsz,), 0, 4)

    # Supervised (labels) path, contrast_mode="all".
    loss_sup = jax.block_until_ready(supcon_loss(features, labels=labels))
    ref_sup = supcon_loss_ref(features, labels=labels)

    # Unsupervised SimCLR path (labels=None), same kernel.
    loss_simclr = jax.block_until_ready(supcon_loss(features))
    ref_simclr = supcon_loss_ref(features)

    # contrast_mode="one" path.
    loss_one = jax.block_until_ready(
        supcon_loss(features, labels=labels, contrast_mode="one"))
    ref_one = supcon_loss_ref(features, labels=labels, contrast_mode="one")

    for got, want in ((loss_sup, ref_sup), (loss_simclr, ref_simclr),
                      (loss_one, ref_one)):
        assert got.shape == ()
        assert bool(jnp.isfinite(got))
        assert jnp.allclose(got, want, atol=2e-3, rtol=2e-3), (got, want)

    print("KERNEL_OK")
</pallas_src>

<mosaic_0001>
module attributes {stable_mosaic.version = 11 : i64} {
  func.func @_supcon_label_kernel(%arg0: i32, %arg1: memref<32x1xi32, #tpu.memory_space<vmem>>, %arg2: memref<1x64xi32, #tpu.memory_space<vmem>>, %arg3: memref<32x128xbf16, #tpu.memory_space<vmem>>, %arg4: memref<128x64xbf16, #tpu.memory_space<vmem>>, %arg5: memref<32x1xf32, #tpu.memory_space<vmem>>) attributes {dimension_semantics = [#tpu.dimension_semantics<parallel>], iteration_bounds = array<i64: 2>, scalar_prefetch = 0 : i64, scratch_operands = 0 : i64, tpu.core_type = #tpu.core_type<tc>, window_params = [{transform_indices = @transform_0, window_bounds = array<i64: 32, 1>}, {pipeline_mode = #tpu.pipeline_mode<synchronous>, transform_indices = @transform_1, window_bounds = array<i64: 1, 64>}, {transform_indices = @transform_2, window_bounds = array<i64: 32, 128>}, {pipeline_mode = #tpu.pipeline_mode<synchronous>, transform_indices = @transform_3, window_bounds = array<i64: 128, 64>}, {transform_indices = @transform_4, window_bounds = array<i64: 32, 1>}]} {
    %c0 = arith.constant 0 : index
    %c0_0 = arith.constant 0 : index
    %0 = vector.load %arg3[%c0, %c0_0] : memref<32x128xbf16, #tpu.memory_space<vmem>>, vector<32x128xbf16>
    %c0_1 = arith.constant 0 : index
    %c0_2 = arith.constant 0 : index
    %1 = vector.load %arg4[%c0_1, %c0_2] : memref<128x64xbf16, #tpu.memory_space<vmem>>, vector<128x64xbf16>
    %cst = arith.constant dense<0.000000e+00> : vector<32x64xf32>
    %2 = tpu.matmul %0, %1, %cst {dimension_numbers = #tpu.dot_dimension_numbers<[1], [0], [0], [1], [0, 0, 1, 1], [], []>} : vector<32x128xbf16>, vector<128x64xbf16>, vector<32x64xf32> -> vector<32x64xf32>
    %cst_3 = arith.constant 14.2857141 : f32
    %3 = vector.broadcast %cst_3 : f32 to vector<32x64xf32>
    %4 = arith.mulf %2, %3 : vector<32x64xf32>
    %c32_i32 = arith.constant 32 : i32
    %5 = arith.muli %arg0, %c32_i32 : i32
    %6 = tpu.iota {dimensions = array<i32: 0>} : vector<32x1xi32>
    %7 = vector.broadcast %5 : i32 to vector<32x1xi32>
    %8 = arith.addi %7, %6 : vector<32x1xi32>
    %9 = tpu.iota {dimensions = array<i32: 1>} : vector<1x64xi32>
    %10 = vector.broadcast %8 : vector<32x1xi32> to vector<32x64xi32>
    %11 = vector.broadcast %9 : vector<1x64xi32> to vector<32x64xi32>
    %12 = arith.cmpi ne, %10, %11 : vector<32x64xi32>
    %c0_4 = arith.constant 0 : index
    %c0_5 = arith.constant 0 : index
    %13 = vector.load %arg1[%c0_4, %c0_5] : memref<32x1xi32, #tpu.memory_space<vmem>>, vector<32x1xi32>
    %c0_6 = arith.constant 0 : index
    %c0_7 = arith.constant 0 : index
    %14 = vector.load %arg2[%c0_6, %c0_7] : memref<1x64xi32, #tpu.memory_space<vmem>>, vector<1x64xi32>
    %15 = vector.broadcast %13 : vector<32x1xi32> to vector<32x64xi32>
    %16 = vector.broadcast %14 : vector<1x64xi32> to vector<32x64xi32>
    %17 = arith.cmpi eq, %15, %16 : vector<32x64xi32>
    %18 = arith.andi %17, %12 : vector<32x64xi1>
    %cst_8 = arith.constant dense<0xFF800000> : vector<32xf32>
    %19 = vector.multi_reduction <maximumf>, %4, %cst_8 [1] : vector<32x64xf32> to vector<32xf32>
    %20 = vector.shape_cast %19 : vector<32xf32> to vector<32x1xf32>
    %cst_9 = arith.constant dense<0x7F800000> : vector<32xf32>
    %21 = vector.multi_reduction <minimumf>, %4, %cst_9 [1] : vector<32x64xf32> to vector<32xf32>
    %22 = vector.shape_cast %21 : vector<32xf32> to vector<32x1xf32>
    %23 = arith.subf %22, %20 : vector<32x1xf32>
    %24 = tpu.reciprocal %23 {approx = true} : vector<32x1xf32> -> vector<32x1xf32>
    %25 = vector.broadcast %20 : vector<32x1xf32> to vector<32x64xf32>
    %26 = arith.subf %4, %25 : vector<32x64xf32>
    %27 = vector.broadcast %24 : vector<32x1xf32> to vector<32x64xf32>
    %28 = arith.mulf %26, %27 : vector<32x64xf32>
    %29 = math.exp %28 : vector<32x64xf32>
    %cst_10 = arith.constant 0.000000e+00 : f32
    %30 = vector.broadcast %cst_10 : f32 to vector<32x64xf32>
    %31 = arith.select %12, %29, %30 : vector<32x64xi1>, vector<32x64xf32>
    %cst_11 = arith.constant dense<0.000000e+00> : vector<32xf32>
    %32 = vector.multi_reduction <add>, %31, %cst_11 [1] : vector<32x64xf32> to vector<32xf32>
    %33 = vector.shape_cast %32 : vector<32xf32> to vector<32x1xf32>
    %34 = math.log %33 : vector<32x1xf32>
    %35 = vector.broadcast %34 : vector<32x1xf32> to vector<32x64xf32>
    %36 = arith.subf %28, %35 : vector<32x64xf32>
    %37 = arith.extui %18 : vector<32x64xi1> to vector<32x64xi32>
    %38 = arith.sitofp %37 : vector<32x64xi32> to vector<32x64xf32>
    %cst_12 = arith.constant dense<0.000000e+00> : vector<32xf32>
    %39 = vector.multi_reduction <add>, %38, %cst_12 [1] : vector<32x64xf32> to vector<32xf32>
    %40 = vector.shape_cast %39 : vector<32xf32> to vector<32x1xf32>
    %cst_13 = arith.constant 0.000000e+00 : f32
    %41 = vector.broadcast %cst_13 : f32 to vector<32x64xf32>
    %42 = arith.select %18, %36, %41 : vector<32x64xi1>, vector<32x64xf32>
    %cst_14 = arith.constant dense<0.000000e+00> : vector<32xf32>
    %43 = vector.multi_reduction <add>, %42, %cst_14 [1] : vector<32x64xf32> to vector<32xf32>
    %44 = vector.shape_cast %43 : vector<32xf32> to vector<32x1xf32>
    %45 = tpu.reciprocal %40 {approx = true} : vector<32x1xf32> -> vector<32x1xf32>
    %46 = arith.mulf %44, %45 : vector<32x1xf32>
    %cst_15 = arith.constant -1.000000e+00 : f32
    %47 = vector.broadcast %cst_15 : f32 to vector<32x1xf32>
    %48 = arith.mulf %47, %46 : vector<32x1xf32>
    %c0_16 = arith.constant 0 : index
    %c0_17 = arith.constant 0 : index
    %49 = vector.load %arg5[%c0_16, %c0_17] : memref<32x1xf32, #tpu.memory_space<vmem>>, vector<32x1xf32>
    tpu.vector_store %arg5[%c0_16, %c0_17], %48 {strides = array<i32>} : memref<32x1xf32, #tpu.memory_space<vmem>>, vector<32x1xf32>,
    return
  }
  func.func @transform_0(%arg0: i32) -> (i32, i32) {
    %c0_i32 = arith.constant 0 : i32
    %c0_i32_0 = arith.constant 0 : i32
    return %arg0, %c0_i32 : i32, i32
  }
  func.func @transform_1(%arg0: i32) -> (i32, i32) {
    %c0_i32 = arith.constant 0 : i32
    %c0_i32_0 = arith.constant 0 : i32
    %c0_i32_1 = arith.constant 0 : i32
    return %c0_i32, %c0_i32_0 : i32, i32
  }
  func.func @transform_2(%arg0: i32) -> (i32, i32) {
    %c0_i32 = arith.constant 0 : i32
    %c0_i32_0 = arith.constant 0 : i32
    return %arg0, %c0_i32 : i32, i32
  }
  func.func @transform_3(%arg0: i32) -> (i32, i32) {
    %c0_i32 = arith.constant 0 : i32
    %c0_i32_0 = arith.constant 0 : i32
    %c0_i32_1 = arith.constant 0 : i32
    return %c0_i32, %c0_i32_0 : i32, i32
  }
  func.func @transform_4(%arg0: i32) -> (i32, i32) {
    %c0_i32 = arith.constant 0 : i32
    %c0_i32_0 = arith.constant 0 : i32
    return %arg0, %c0_i32 : i32, i32
  }
}

</mosaic_0001>

<bundles_post_ra>
// kernel: tpu_custom_call.1
= control target key start
LH: loop header
LB: loop body
LE: loop exit
PB: predicated region body
PF: predicated region fallthrough
CT: control target
= control target key end

     0   :  { %s724_s15 = smov 0   ;;  %s877_s0 = inlined_call_operand.vmem [shape: s32[64,1], index: 0, kind: input, shape index: {}]   ;;  %s878_s1 = inlined_call_operand.vmem [shape: s32[1,64], index: 1, kind: input, shape index: {}]   ;;  %s879_s2 = inlined_call_operand.vmem [shape: bf16[64,128], index: 2, kind: input, shape index: {}]   ;;  %s880_s3 = inlined_call_operand.vmem [shape: bf16[128,64], index: 3, kind: input, shape index: {}]   ;;  %s881_s4 = inlined_call_operand.vmem [shape: f32[64,1], index: 4, kind: output, shape index: {}]  }
   0x1 LB: > { %s567_s16 = sadd.s32 4294967295, %s695_s15   ;;  %p571_p0 = scmp.ge.s32.totalorder %s695_s15, 1  ;;  %s695_s15 = sphi %s724_s15, %s14_s15  }
   0x2   : > { %p174_p1 = scmp.lt.s32.totalorder %s695_s15, 3 }
   0x4   : > { %p175_p2 = pnand %p571_p0, %p174_p1 }
   0x5   : > { %s572_s25 = sshll.u32 (!%p175_p2), %s567_s16, 2  ;;  %s618_s18 = sshll.u32 (!%p175_p2), %s567_s16, 5 }
   0x6   : > { %178 = sbr.rel (%p175_p2) target bundleno = 602 (0x25a), region = 36  ;;  %p206_p3 = scmp.lt.s32.totalorder (!%p175_p2), %s572_s25, 7 }
   0xb   : > { %v634_v0 = vld [vmem:[%s880_s3 + $0x38] sm:$0xff]  ;;  %v633_v1 = vld [vmem:[%s880_s3 + $0x30] sm:$0xff]  ;;  %v632_v2 = vld [vmem:[%s880_s3 + $0x28] sm:$0xff]  ;;  %s887_s25 = smov (!%p206_p3, %s572_s25), 7  ;;  %v697_v10 = vmov 0   ;;  %vm369_vm0 = vcmask 523264   ;;  %v327_v35 = vlaneseq  ;;  %v332_v46 = vstv %s618_s18 }
   0xc   : > { %303 = vmatpush.bf16.msra.mxu0 %v634_v0  ;;  %635 = vmatpush.bf16.msra.mxu1 %v634_v0  ;;  %v631_v3 = vld [vmem:[%s880_s3 + $0x20] sm:$0xff]  ;;  %v630_v4 = vld [vmem:[%s880_s3 + $0x18] sm:$0xff]  ;;  %v629_v5 = vld [vmem:[%s880_s3 + $0x10] sm:$0xff]  ;;  %s575_s6 = sshll.u32 %s887_s25, 2  ;;  %s573_s12 = sshll.u32 %s887_s25, 3  ;;  %vm494_vm13 = vcmask 7168  }
   0xd   : > { %v628_v6 = vld [vmem:[%s880_s3 + $0x8] sm:$0xff]  ;;  %v627_v7 = vld [vmem:[%s880_s3] sm:$0xff]  ;;  %s215_s11 = scalar_lea.vmem %s879_s2, %s575_s6  ;;  %653 = vset.pattern.permute.xlu2 %v697_v10  ;;  %654 = vset.pattern.permute.xlu1 %v697_v10  ;;  %s782_s17 = scalar_lea.vmem %s877_s0, %s573_s12  ;;  %v328_v36 = vshrl.u32 %v327_v35, 7  ;;  %v795_v50 = vand.u32 127, %v327_v35 }
   0xe   : > { %v625_v8 = vld [vmem:[%s215_s11] sm:$0xff]  ;;  %v626_v9 = vld [vmem:[%s215_s11 + $0x8] sm:$0xff]  ;;  %655 = vset.pattern.permute.xlu0 %v697_v10  ;;  %s221_s22 = scalar_lea.vmem %s881_s4, %s573_s12 }
   0xf   : > { %v343_v27 = vld [vmem:[%s782_s17] sm:$0xff]  ;;  %v330_v44 = vadd.s32 16, %v328_v36  ;;  %v333_v51 = vadd.s32 %v332_v46, %v328_v36  ;;  %v329_v58 = vadd.s32 8, %v328_v36 }
  0x10   : > { %304 = vmatpush.bf16.msra.mxu0 %v633_v1  ;;  %636 = vmatpush.bf16.msra.mxu1 %v633_v1 }
  0x11   : > { %v793_v49 = vadd.s32 %v332_v46, %v330_v44  ;;  %vm339_vm2 = vcmp.ne.s32.totalorder %v333_v51, %v795_v50 }
  0x13   : > { %vm341_vm1 = vcmp.ne.s32.totalorder %v793_v49, %v795_v50 }
  0x14   : > { %305 = vmatpush.bf16.msra.mxu0 %v632_v2  ;;  %637 = vmatpush.bf16.msra.mxu1 %v632_v2  ;;  %v334_v2 = vadd.s32 %v332_v46, %v329_v58 }
  0x16   : > { %vm340_vm3 = vcmp.ne.s32.totalorder %v334_v2, %v795_v50 }
  0x18   : > { %306 = vmatpush.bf16.msra.mxu0 %v631_v3  ;;  %638 = vmatpush.bf16.msra.mxu1 %v631_v3 }
  0x1c   : > { %307 = vmatpush.bf16.msra.mxu0 %v630_v4  ;;  %639 = vmatpush.bf16.msra.mxu1 %v630_v4 }
  0x20   : > { %308 = vmatpush.bf16.msra.mxu0 %v629_v5  ;;  %640 = vmatpush.bf16.msra.mxu1 %v629_v5 }
  0x24   : > { %309 = vmatpush.bf16.msra.mxu0 %v628_v6  ;;  %641 = vmatpush.bf16.msra.mxu1 %v628_v6  ;;  %v331_v6 = vadd.s32 24, %v328_v36 }
  0x28   : > { %310 = vmatpush.bf16.msra.mxu0 %v627_v7  ;;  %642 = vmatpush.bf16.msra.mxu1 %v627_v7 }
  0x2b   : > { %311 = vmatmul.bf16.vlgmr.msra.gmra.mxu0 %v625_v8  ;;  %316 = vmatmul.bf16.vlgmr.msra.gmra.mxu1 %v626_v9 }
  0xa8   : > { %v312_v11 = vpop.f32.mrf.mxu0  ;;  %v317_v12 = vpop.f32.mrf.mxu1 }
  0xa9   : > { %v322_v13 = vmul.f32 14.285714, %v312_v11  ;;  %v324_v14 = vmul.f32 14.285714, %v317_v12  ;;  %v336_v11 = vadd.s32 %v332_v46, %v331_v6 }
  0xab   : > { %v376_v15 = vsel %vm369_vm0, %v324_v14, -inf  ;;  %v370_v16 = vsel %vm369_vm0, %v322_v13, -inf  ;;  %v388_v19 = vsel %vm369_vm0, %v324_v14, inf  ;;  %v382_v20 = vsel %vm369_vm0, %v322_v13, inf }
  0xac   : > { %377 = vmax.xlane.f32.xlu2 %v376_v15  ;;  %371 = vmax.xlane.f32.xlu0 %v370_v16  ;;  %vm342_vm4 = vcmp.ne.s32.totalorder %v336_v11, %v795_v50  ;;  %v346_v15 = vld [vmem:[%s782_s17 + $0x18] sm:$0xff]  ;;  %v344_v16 = vld [vmem:[%s782_s17 + $0x8] sm:$0xff] }
  0xb0   : > { %v314_v17 = vpop.f32.mrf.mxu0  ;;  %v319_v22 = vpop.f32.mrf.mxu1 }
  0xb1   : > { %v323_v18 = vmul.f32 14.285714, %v314_v17  ;;  %v769_v23 = vmul.f32 14.285714, %v319_v22  ;;  %v345_v17 = vld [vmem:[%s782_s17 + $0x10] sm:$0xff] }
  0xb3   : > { %v373_v21 = vsel %vm369_vm0, %v323_v18, -inf  ;;  %v379_v24 = vsel %vm369_vm0, %v769_v23, -inf  ;;  %v385_v25 = vsel %vm369_vm0, %v323_v18, inf  ;;  %v391_v26 = vsel %vm369_vm0, %v769_v23, inf }
  0xb4   : > { %389 = vmin.xlane.f32.xlu2 %v388_v19  ;;  %383 = vmin.xlane.f32.xlu0 %v382_v20 }
  0xb5   : > { %374 = vmax.xlane.f32.xlu1 %v373_v21  ;;  %v698_v21 = vmov 0.0  }
  0xbc   : > { %380 = vmax.xlane.f32.xlu0 %v379_v24 }
  0xbd   : > { %386 = vmin.xlane.f32.xlu1 %v385_v25 }
  0xc5   : > { %392 = vmin.xlane.f32.xlu1 %v391_v26 }
  0xcc   : > { %349 = vperm.xlu2 %653, %v343_v27  }
 0x11f   : > { %v378_v28 = vpop.xlane.xlu2 %377  ;;  %v372_v29 = vpop.xlane.xlu0 %371 }
 0x120   : > { %v404_v37 = vsub.f32 %v324_v14, %v378_v28  ;;  %v402_v39 = vsub.f32 %v322_v13, %v372_v29 }
 0x127   : > { %v390_v30 = vpop.xlane.xlu2 %389  ;;  %v384_v31 = vpop.xlane.xlu0 %383 }
 0x128   : > { %v396_v32 = vsub.f32 %v390_v30, %v378_v28  ;;  %v394_v33 = vsub.f32 %v384_v31, %v372_v29  ;;  %v375_v34 = vpop.xlane.xlu1 %374 }
 0x129   : > { %v403_v52 = vsub.f32 %v323_v18, %v375_v34  ;;  %v656_v18 = vld [vmem:[%s878_s1] ss:$0 sm:$0xff] }
 0x12a   : > { %657 = vrcp.f32 %v396_v32 }
 0x12b   : > { %659 = vrcp.f32 %v394_v33 }
 0x12f   : > { %v381_v53 = vpop.xlane.xlu0 %380  ;;  %v350_v19 = vpop.permute.xlu2 %349 }
 0x130   : > { %v658_v38 = vpop.eup %657  ;;  %v387_v40 = vpop.xlane.xlu1 %386  ;;  %v405_v3 = vsub.f32 %v769_v23, %v381_v53  ;;  %vm361_vm5 = vcmp.eq.s32.totalorder %v350_v19, %v656_v18 }
 0x131   : > { %v660_v41 = vpop.eup %659  ;;  %v787_v42 = vmul.f32 %v658_v38, %v404_v37  ;;  %v395_v43 = vsub.f32 %v387_v40, %v375_v34  ;;  %vm830_vm6 = vmand %vm361_vm5, %vm339_vm2 }
 0x132   : > { %v789_v45 = vmul.f32 %v660_v41, %v402_v39  ;;  %v619_v22 = vsel %vm830_vm6, 1.0, %v698_v21 }
 0x133   : > { %661 = vrcp.f32 %v395_v43  ;;  %v414_v47 = vmul.f32 1.442695, %v787_v42  ;;  %v454_v23 = vsel %vm369_vm0, %v619_v22, 0.0 }
 0x134   : > { %v410_v48 = vmul.f32 1.442695, %v789_v45 }
 0x135   : > { %663 = vpow2.f32 %v414_v47 }
 0x136   : > { %665 = vpow2.f32 %v410_v48 }
 0x138   : > { %v393_v54 = vpop.xlane.xlu1 %392 }
 0x139   : > { %v662_v55 = vpop.eup %661  ;;  %v397_v56 = vsub.f32 %v393_v54, %v381_v53 }
 0x13a   : > { %v799_v57 = vmul.f32 %v662_v55, %v403_v52 }
 0x13b   : > { %v664_v59 = vpop.eup %663  ;;  %667 = vrcp.f32 %v397_v56 }
 0x13c   : > { %v666_v60 = vpop.eup %665  ;;  %v420_v61 = vsel %vm341_vm1, %v664_v59, 0.0  ;;  %v412_v62 = vmul.f32 1.442695, %v799_v57 }
 0x13d   : > { %v428_v63 = vsel %vm369_vm0, %v420_v61, 0.0  ;;  %v418_v0 = vsel %vm339_vm2, %v666_v60, 0.0 }
 0x13e   : > { %429 = vadd.xlane.f32.xlu1 %v428_v63  ;;  %v422_v1 = vsel %vm369_vm0, %v418_v0, 0.0  ;;  %669 = vpow2.f32 %v412_v62 }
 0x13f   : > { %423 = vadd.xlane.f32.xlu2 %v422_v1 }
 0x141   : > { %v668_v4 = vpop.eup %667 }
 0x142   : > { %v811_v5 = vmul.f32 %v668_v4, %v405_v3 }
 0x144   : > { %v670_v7 = vpop.eup %669  ;;  %v416_v8 = vmul.f32 1.442695, %v811_v5 }
 0x145   : > { %v419_v9 = vsel %vm340_vm3, %v670_v7, 0.0 }
 0x146   : > { %v425_v10 = vsel %vm369_vm0, %v419_v9, 0.0  ;;  %671 = vpow2.f32 %v416_v8 }
 0x147   : > { %426 = vadd.xlane.f32.xlu0 %v425_v10 }
 0x14c   : > { %v672_v12 = vpop.eup %671 }
 0x14d   : > { %v421_v13 = vsel %vm342_vm4, %v672_v12, 0.0 }
 0x14e   : > { %v431_v14 = vsel %vm369_vm0, %v421_v13, 0.0 }
 0x14f   : > { %432 = vadd.xlane.f32.xlu0 %v431_v14 }
 0x157   : > { %358 = vperm.xlu2 %653, %v346_v15   ;;  %352 = vperm.xlu1 %654, %v344_v16  }
 0x163   : > { %355 = vperm.xlu0 %655, %v345_v17  }
 0x180   : > { %455 = vadd.xlane.f32.xlu2 %v454_v23 }
 0x1b1   : > { %v430_v30 = vpop.xlane.xlu1 %429 }
 0x1b2   : > { %v424_v24 = vpop.xlane.xlu2 %423 }
 0x1ba   : > { %v427_v25 = vpop.xlane.xlu0 %426  ;;  %v359_v26 = vpop.permute.xlu2 %358 }
 0x1bb   : > { %vm364_vm7 = vcmp.eq.s32.totalorder %v359_v26, %v656_v18  ;;  %673 = vlog2.f32 %v427_v25 }
 0x1bc   : > { %vm839_vm8 = vmand %vm364_vm7, %vm342_vm4  ;;  %675 = vlog2.f32 %v424_v24 }
 0x1bd   : > { %v622_v28 = vsel %vm839_vm8, 1.0, %v698_v21 }
 0x1be   : > { %v463_v29 = vsel %vm369_vm0, %v622_v28, 0.0 }
 0x1bf   : > { %464 = vadd.xlane.f32.xlu2 %v463_v29 }
 0x1c1   : > { %v674_v32 = vpop.eup %673 }
 0x1c2   : > { %v433_v31 = vpop.xlane.xlu0 %432  ;;  %v437_v33 = vmul.f32 0.6931472, %v674_v32  ;;  %v676_v34 = vpop.eup %675 }
 0x1c3   : > { %677 = vlog2.f32 %v433_v31  ;;  %v435_v37 = vmul.f32 0.6931472, %v676_v34 }
 0x1c4   : > { %v443_v39 = vsub.f32 %v799_v57, %v437_v33  ;;  %679 = vlog2.f32 %v430_v30 }
 0x1c5   : > { %v442_v46 = vsub.f32 %v789_v45, %v435_v37 }
 0x1c7   : > { %v466_v51 = vsel %vm830_vm6, %v442_v46, 0.0 }
 0x1c8   : > { %v470_v55 = vsel %vm369_vm0, %v466_v51, 0.0 }
 0x1c9   : > { %v678_v35 = vpop.eup %677  ;;  %v353_v36 = vpop.permute.xlu1 %352 }
 0x1ca   : > { %v441_v38 = vmul.f32 0.6931472, %v678_v35  ;;  %vm362_vm9 = vcmp.eq.s32.totalorder %v353_v36, %v656_v18  ;;  %v680_v48 = vpop.eup %679 }
 0x1cb   : > { %vm366_vm10 = vmand %vm362_vm9, %vm340_vm3  ;;  %v439_v53 = vmul.f32 0.6931472, %v680_v48 }
 0x1cc   : > { %v620_v40 = vsel %vm366_vm10, 1.0, %v698_v21  ;;  %v467_v41 = vsel %vm366_vm10, %v443_v39, 0.0  ;;  %v445_v47 = vsub.f32 %v811_v5, %v441_v38 }
 0x1cd   : > { %v457_v43 = vsel %vm369_vm0, %v620_v40, 0.0  ;;  %v473_v44 = vsel %vm369_vm0, %v467_v41, 0.0  ;;  %v444_v57 = vsub.f32 %v787_v42, %v439_v53 }
 0x1ce   : > { %458 = vadd.xlane.f32.xlu1 %v457_v43  ;;  %474 = vadd.xlane.f32.xlu2 %v473_v44  ;;  %v469_v52 = vsel %vm839_vm8, %v445_v47, 0.0 }
 0x1cf   : > { %v479_v56 = vsel %vm369_vm0, %v469_v52, 0.0 }
 0x1d5   : > { %v356_v54 = vpop.permute.xlu0 %355 }
 0x1d6   : > { %vm363_vm11 = vcmp.eq.s32.totalorder %v356_v54, %v656_v18  ;;  %471 = vadd.xlane.f32.xlu1 %v470_v55  ;;  %480 = vadd.xlane.f32.xlu2 %v479_v56 }
 0x1d7   : > { %vm367_vm12 = vmand %vm363_vm11, %vm341_vm1 }
 0x1d8   : > { %v621_v45 = vsel %vm367_vm12, 1.0, %v698_v21  ;;  %v468_v59 = vsel %vm367_vm12, %v444_v57, 0.0 }
 0x1d9   : > { %v460_v58 = vsel %vm369_vm0, %v621_v45, 0.0  ;;  %v476_v60 = vsel %vm369_vm0, %v468_v59, 0.0 }
 0x1da   : > { %461 = vadd.xlane.f32.xlu0 %v460_v58 }
 0x1de   : > { %477 = vadd.xlane.f32.xlu1 %v476_v60 }
 0x1f3   : > { %v456_v61 = vpop.xlane.xlu2 %455 }
 0x232   : > { %v465_v62 = vpop.xlane.xlu2 %464 }
 0x241   : > { %v459_v63 = vpop.xlane.xlu1 %458  ;;  %v475_v0 = vpop.xlane.xlu2 %474 }
 0x242   : > { %681 = vrcp.f32 %v459_v63 }
 0x243   : > { %683 = vrcp.f32 %v456_v61 }
 0x244   : > { %685 = vrcp.f32 %v465_v62 }
 0x248   : > { %v682_v1 = vpop.eup %681 }
 0x249   : > { %v684_v49 = vpop.eup %683  ;;  %v487_v50 = vmul.f32 %v682_v1, %v475_v0  ;;  %v472_v2 = vpop.xlane.xlu1 %471 }
 0x24a   : > { %v486_v3 = vmul.f32 %v684_v49, %v472_v2  ;;  %v481_v6 = vpop.xlane.xlu2 %480  ;;  %v686_v7 = vpop.eup %685 }
 0x24b   : > { %v491_v4 = vmul.f32 -1.0, %v487_v50  ;;  %v489_v9 = vmul.f32 %v686_v7, %v481_v6 }
 0x24c   : > { %v490_v42 = vmul.f32 -1.0, %v486_v3 }
 0x24d   : > { %v462_v5 = vpop.xlane.xlu0 %461  ;;  %496 = vst.msk [vmem:[%s221_s22 + $0x8] sm:$0xff] %vm494_vm13, %v491_v4  ;;  %v493_v13 = vmul.f32 -1.0, %v489_v9 }
 0x24e   : > { %495 = vst.msk [vmem:[%s221_s22] sm:$0xff] %vm494_vm13, %v490_v42  ;;  %687 = vrcp.f32 %v462_v5 }
 0x24f   : > { %498 = vst.msk [vmem:[%s221_s22 + $0x18] sm:$0xff] %vm494_vm13, %v493_v13 }
 0x251   : > { %v478_v10 = vpop.xlane.xlu1 %477 }
 0x254   : > { %v688_v8 = vpop.eup %687 }
 0x255   : > { %v488_v11 = vmul.f32 %v688_v8, %v478_v10 }
 0x257   : > { %v492_v12 = vmul.f32 -1.0, %v488_v11 }
 0x259   : > { %497 = vst.msk [vmem:[%s221_s22 + $0x10] sm:$0xff] %vm494_vm13, %v492_v12 }
 0x25a PF: > { %s14_s15 = sadd.s32 1, %s695_s15  }
 0x25b   : > { %p11_p4 = scmp.ge.s32.totalorder %s14_s15, 4  }
 0x25d   :  { %13 = sbr.rel (!%p11_p4) target bundleno = 1 (0x1), region = 69 }

</bundles_post_ra>
